<compile_context>
chip_gen: v7x
topology: tpu7x:2x2x1
jax: 0.10.0
libtpu: 0.0.40
codegen_flags: <defaults>
</compile_context>

<pallas_src>
import functools

import jax
import jax.numpy as jnp
from jax import lax
from jax.experimental import pallas as pl
from jax.experimental.pallas import tpu as pltpu

LEAKY_SLOPE = 0.01  # torch.nn.LeakyReLU default


def _leaky(v):
    return jnp.where(v >= 0, v, LEAKY_SLOPE * v)


def _round_up(n, m):
    return (n + m - 1) // m * m


# ---------------------------------------------------------------------------
# Kernel body: one batch tile (Nb samples) per grid step, two MXU dots total.
# ---------------------------------------------------------------------------
def _kernel_body(k1, k2, d1, d2, L, Nb, cin_p, cout_p,
                 x_ref, w1_ref, b1_ref, w2_ref, b2_ref, o_ref):
    nbl = Nb * L
    pad1 = d1 * (k1 - 1) // 2
    pad2 = d2 * (k2 - 1) // 2

    w1 = w1_ref[...]            # (cout_p, k1*cin_p)           bf16
    w2 = w2_ref[...]            # (cout_p, k2*cout_p + cin_p)  bf16 (conv2 + residual)
    b1 = b1_ref[...]            # (cout_p, 1) f32
    b2 = b2_ref[...]            # (cout_p, 1) f32 (includes merge bias if any)

    # Activations arrive in bf16 (half DMA); pointwise / roll math is f32.
    xb = x_ref[...].astype(jnp.float32)      # (cin_p, Nb*L)

    # Lane position inside its own length-L sample; hoisted once per step.
    col = lax.broadcasted_iota(jnp.int32, (1, nbl), 1) % L

    def tap_stack(a, k, d, pad):
        """Stack k circularly-shifted copies of `a` along sublanes.

        `a` is (C, Nb*L) with Nb independent length-L samples side by side on
        the lane axis.  A per-sample roll by s equals the global roll by s
        everywhere except each sample's first s columns, which need the global
        roll by s-L; a lane-mask select patches those.  2 XLU rolls + 1 VPU
        select per tap, independent of Nb.
        """
        rows = []
        for t in range(k):
            s = (pad - d * t) % L
            if s == 0:
                rows.append(a)
            else:
                body = pltpu.roll(a, s, 1)
                head = pltpu.roll(a, (s - L) % nbl, 1)
                rows.append(jnp.where(col < s, head, body))
        return jnp.concatenate(rows, axis=0)          # (k*C, Nb*L), tile-aligned f32

    # ---- conv1: single MXU dot over the stacked (k1*cin_p) contraction ----
    x1 = tap_stack(xb, k1, d1, pad1).astype(jnp.bfloat16)            # (k1*cin_p, Nb*L)
    h = jnp.dot(w1, x1, preferred_element_type=jnp.float32) + b1     # (cout_p, Nb*L) f32
    h = _leaky(h)            # padded rows of w1/b1 are zero -> padded rows of h stay 0

    # ---- conv2 + residual in one dot: trailing [xb] block hits the ----
    # ---- appended repeat / identity / merge columns of w2.          ----
    x2 = jnp.concatenate([tap_stack(h, k2, d2, pad2), xb],
                         axis=0).astype(jnp.bfloat16)                # (k2*cout_p+cin_p, Nb*L)
    y = _leaky(jnp.dot(w2, x2, preferred_element_type=jnp.float32) + b2)

    # Tile-aligned per-sample stores into the (Nb, cout_p, L) output block
    # (avoids an extra HBM transpose pass in the wrapper).
    for b in range(Nb):
        o_ref[b] = y[:, b * L:(b + 1) * L].astype(o_ref.dtype)


# ---------------------------------------------------------------------------
# Parameter preparation (run ONCE per module instance, outside the hot path).
# ---------------------------------------------------------------------------
def prepare_unet_res_conv_params(w1, b1, w2, b2, wm=None, bm=None, dilation=(1, 1)):
    """w1: (cout, cin, k1); w2: (cout, cout, k2); optional 1x1 merge conv
    wm/bm: (cout, cin, 1)/(cout,) (torch layouts).  Returns stacked bf16
    weight slabs with the residual branch folded into the conv2 slab."""
    f32 = jnp.float32
    cout, cin, k1 = w1.shape
    cout2, cout_w, k2 = w2.shape
    assert cout2 == cout and cout_w == cout
    d1, d2 = dilation
    fac = cout / cin
    if fac > 1:
        assert cout == int(fac) * cin, "channel-repeat branch needs cout % cin == 0"
    if fac < 1:
        assert wm is not None and bm is not None, "merge conv weights required"

    cin_p = _round_up(cin, 8)
    cout_p = _round_up(cout, 8)

    # conv1 slab: (cout_p, k1*cin_p), taps stacked along the contraction axis.
    w1_p = jnp.pad(w1.astype(f32), ((0, cout_p - cout), (0, cin_p - cin), (0, 0)))
    w1s = jnp.transpose(w1_p, (0, 2, 1)).reshape(cout_p, k1 * cin_p).astype(jnp.bfloat16)
    b1_p = jnp.pad(b1.astype(f32), (0, cout_p - cout)).reshape(cout_p, 1)

    # conv2 slab, output channels padded to cout_p, + residual columns appended.
    w2_p = jnp.pad(w2.astype(f32), ((0, cout_p - cout), (0, cout_p - cout), (0, 0)))
    w2s = jnp.transpose(w2_p, (0, 2, 1)).reshape(cout_p, k2 * cout_p)

    if fac > 1:                         # x.repeat(1, fac, 1) as a 0/1 matrix
        res_w = jnp.tile(jnp.eye(cin, dtype=f32), (int(fac), 1))
        res_b = jnp.zeros((cout,), f32)
    elif fac < 1:                       # 1x1 merge conv
        res_w = wm.astype(f32).reshape(cout, cin)
        res_b = bm.astype(f32)
    else:                               # identity skip
        res_w = jnp.eye(cout, dtype=f32)
        res_b = jnp.zeros((cout,), f32)
    res_w = jnp.pad(res_w, ((0, cout_p - cout), (0, cin_p - cin)))

    w2aug = jnp.concatenate([w2s, res_w], axis=1).astype(jnp.bfloat16)
    b2aug = jnp.pad(b2.astype(f32) + res_b, (0, cout_p - cout)).reshape(cout_p, 1)

    meta = dict(cin=cin, cout=cout, cin_p=cin_p, cout_p=cout_p,
                k1=k1, k2=k2, d1=d1, d2=d2)
    return dict(w1s=w1s, b1=b1_p, w2aug=w2aug, b2=b2aug, meta=meta)


# ---------------------------------------------------------------------------
# Block-size / VMEM-budget heuristics.
# ---------------------------------------------------------------------------
def _vmem_bytes(Nb, L, cin_p, cout_p, k1, k2, out_bytes):
    """Per-step VMEM footprint estimate, including im2col temporaries."""
    nbl = Nb * L
    act_in = 2 * (2 * cin_p * nbl)                           # bf16 input block, 2-buffered
    act_out = 2 * (out_bytes * cout_p * nbl)                 # output block, 2-buffered
    stack_cols = k1 * cin_p + k2 * cout_p + cin_p
    im2col = (4 + 2) * stack_cols * nbl                      # f32 stack + bf16 operand copy
    interm = 4 * (2 * cout_p + cin_p) * nbl                  # h, y, xb(f32)
    weights = 2 * 2 * (cout_p * k1 * cin_p + cout_p * (k2 * cout_p + cin_p)) \
        + 2 * 4 * 2 * cout_p
    return int(1.5 * (act_in + act_out + im2col + interm)) + weights


def _vmem_budget():
    # Derive from the device when possible; cap well below physical capacity
    # (v7x has only 64 MiB/TC and Mosaic needs internal-scratch headroom).
    cap = 64 * 2 ** 20
    try:
        info = pltpu.get_tpu_info()
        cap = int(getattr(info, "vmem_capacity_bytes", cap))
    except Exception:
        pass
    return min(int(0.75 * cap), 96 * 2 ** 20)


def _pick_batch_block(N, L, cin_p, cout_p, k1, k2, out_bytes, budget, max_nb=None):
    """Largest Nb dividing N such that the grid keeps >= 4 steps (>= 2 per
    TensorCore on v7x) and the per-step footprint fits the VMEM budget;
    relaxes to >= 2 / >= 1 steps when N is small.  Maximizing Nb under those
    constraints gives the fat per-step blocks v5e/v6e want."""
    divisors = [d for d in range(1, N + 1) if N % d == 0]
    if max_nb is not None:
        divisors = [d for d in divisors if d <= max_nb] or [1]

    def ok(d):
        lane_ok = (d * L) % 128 == 0 or d == N        # (cin_p, Nb*L) block constraint
        return lane_ok and _vmem_bytes(d, L, cin_p, cout_p, k1, k2, out_bytes) <= budget

    for min_grid in (4, 2, 1):
        cands = [d for d in divisors if N // d >= min_grid and ok(d)]
        if cands:
            return max(cands)
    return 1


# ---------------------------------------------------------------------------
# Forward pass.
# ---------------------------------------------------------------------------
def unet_res_conv_apply(params, x, *, out_dtype=jnp.float32, batch_block=None):
    """x: (N, cin, L).  Returns (N, cout, L) in `out_dtype` (pass bf16 when the
    consumer accepts it: halves HBM writeback on this memory-bound kernel)."""
    m = params["meta"]
    cin, cout = m["cin"], m["cout"]
    cin_p, cout_p = m["cin_p"], m["cout_p"]
    k1, k2, d1, d2 = m["k1"], m["k2"], m["d1"], m["d2"]

    N, cin_x, L = x.shape
    assert cin_x == cin
    # NOTE: L should be a multiple of 128 for lane-dense rolls/stores; other L
    # still lowers correctly but with masked multi-op sequences.

    out_bytes = jnp.dtype(out_dtype).itemsize
    budget = _vmem_budget()
    Nb = _pick_batch_block(N, L, cin_p, cout_p, k1, k2, out_bytes, budget,
                           max_nb=batch_block)
    grid = (N // Nb,)

    # Fused transpose + channel-pad + bf16 cast: one pass over x in HBM and a
    # half-width activation DMA into the kernel.
    x_t = jnp.transpose(x, (1, 0, 2)).reshape(cin, N * L)
    x_t = jnp.pad(x_t, ((0, cin_p - cin), (0, 0))).astype(jnp.bfloat16)

    kernel = functools.partial(_kernel_body, k1, k2, d1, d2, L, Nb, cin_p, cout_p)

    in_specs = [
        pl.BlockSpec((cin_p, Nb * L), lambda n: (0, n)),
        # Weight/bias slabs are tiny at these channel counts; default
        # double-buffering is fine.  (At large cout, pin them via scratch DMA.)
        pl.BlockSpec((cout_p, k1 * cin_p), lambda n: (0, 0)),
        pl.BlockSpec((cout_p, 1), lambda n: (0, 0)),
        pl.BlockSpec((cout_p, k2 * cout_p + cin_p), lambda n: (0, 0)),
        pl.BlockSpec((cout_p, 1), lambda n: (0, 0)),
    ]
    out_spec = pl.BlockSpec((Nb, cout_p, L), lambda n: (n, 0, 0))

    vmem_limit = int(min(budget,
                         max(16 * 2 ** 20,
                             _vmem_bytes(Nb, L, cin_p, cout_p, k1, k2, out_bytes)
                             + 2 * 2 ** 20)))

    out = pl.pallas_call(
        kernel,
        out_shape=jax.ShapeDtypeStruct((N, cout_p, L), out_dtype),
        grid_spec=pltpu.PrefetchScalarGridSpec(
            num_scalar_prefetch=0,
            grid=grid,
            in_specs=in_specs,
            out_specs=out_spec,
        ),
        compiler_params=pltpu.CompilerParams(
            dimension_semantics=("parallel",),
            vmem_limit_bytes=vmem_limit,
        ),
    )(x_t, params["w1s"], params["b1"], params["w2aug"], params["b2"])

    return out if cout_p == cout else out[:, :cout, :]


def unet_res_conv(x, w1, b1, w2, b2, wm=None, bm=None, dilation=(1, 1),
                  out_dtype=jnp.float32, batch_block=None):
    """Convenience one-shot wrapper (prepares the weight slabs on every call;
    prefer prepare_unet_res_conv_params + unet_res_conv_apply in hot loops)."""
    params = prepare_unet_res_conv_params(w1, b1, w2, b2, wm, bm, dilation)
    return unet_res_conv_apply(params, x, out_dtype=out_dtype, batch_block=batch_block)


# ---------------------------------------------------------------------------
# Pure-JAX reference (independent path: jnp.pad(wrap) + lax.conv).
# matmul_dtype=bfloat16 mimics the kernel's MXU operand rounding
# (activations/weights rounded to bf16, f32 accumulation & pointwise math).
# ---------------------------------------------------------------------------
def _ref_circ_conv1d(x, w, b, pad, dil):
    if pad:
        x = jnp.pad(x, ((0, 0), (0, 0), (pad, pad)), mode="wrap")
    y = lax.conv_general_dilated(
        x, w, window_strides=(1,), padding="VALID", rhs_dilation=(dil,),
        dimension_numbers=("NCH", "OIH", "NCH"))
    return y + b[None, :, None]


def ref_forward(x, w1, b1, w2, b2, wm=None, bm=None, dilation=(1, 1),
                matmul_dtype=jnp.float32):
    f32 = jnp.float32

    def q(a):
        return a.astype(matmul_dtype).astype(f32)

    cout, cin, k1 = w1.shape
    k2 = w2.shape[2]
    d1, d2 = dilation
    fac = cout / cin
    h = _leaky(_ref_circ_conv1d(q(x), q(w1), b1.astype(f32), d1 * (k1 - 1) // 2, d1))
    y = _ref_circ_conv1d(q(h), q(w2), b2.astype(f32), d2 * (k2 - 1) // 2, d2)
    if fac > 1:
        res = jnp.tile(q(x), (1, int(fac), 1))
    elif fac < 1:
        res = _ref_circ_conv1d(q(x), q(wm), bm.astype(f32), 0, 1)
    else:
        res = q(x)
    return _leaky(res + y)


if __name__ == "__main__":
    key = jax.random.PRNGKey(0)

    def make_case(k, N, cin, cout, L, k1=7, k2=5, merge=False):
        ks = jax.random.split(k, 7)
        x = jax.random.normal(ks[0], (N, cin, L), dtype=jnp.float32)
        w1 = 0.1 * jax.random.normal(ks[1], (cout, cin, k1), dtype=jnp.float32)
        b1 = 0.1 * jax.random.normal(ks[2], (cout,), dtype=jnp.float32)
        w2 = 0.1 * jax.random.normal(ks[3], (cout, cout, k2), dtype=jnp.float32)
        b2 = 0.1 * jax.random.normal(ks[4], (cout,), dtype=jnp.float32)
        wm = bm = None
        if merge:
            wm = 0.1 * jax.random.normal(ks[5], (cout, cin, 1), dtype=jnp.float32)
            bm = 0.1 * jax.random.normal(ks[6], (cout,), dtype=jnp.float32)
        return x, w1, b1, w2, b2, wm, bm

    cases = [
        ("expand fac>1", make_case(jax.random.fold_in(key, 0), 8, 4, 8, 256)),
        ("same   fac=1", make_case(jax.random.fold_in(key, 1), 8, 8, 8, 256)),
        ("reduce fac<1", make_case(jax.random.fold_in(key, 2), 8, 8, 4, 256, merge=True)),
    ]

    for name, (x, w1, b1, w2, b2, wm, bm) in cases:
        # Weight slabs are prepared once per module instance (cold path) ...
        params = prepare_unet_res_conv_params(w1, b1, w2, b2, wm, bm)
        # ... and the jitted hot path only transposes/casts x and runs the kernel.
        fwd = jax.jit(lambda xx, p=params: unet_res_conv_apply(p, xx))
        out = jax.block_until_ready(fwd(x))
        ref = ref_forward(x, w1, b1, w2, b2, wm, bm, matmul_dtype=jnp.bfloat16)
        assert out.shape == ref.shape, (name, out.shape, ref.shape)
        err = float(jnp.max(jnp.abs(out - ref)))
        assert err < 1e-2, (name, err)

    print("KERNEL_OK")
</pallas_src>

<mosaic_0001>
module attributes {stable_mosaic.version = 11 : i64} {
  func.func @_kernel_body(%arg0: i32, %arg1: memref<8x512xbf16, #tpu.memory_space<vmem>>, %arg2: memref<8x56xbf16, #tpu.memory_space<vmem>>, %arg3: memref<8x1xf32, #tpu.memory_space<vmem>>, %arg4: memref<8x48xbf16, #tpu.memory_space<vmem>>, %arg5: memref<8x1xf32, #tpu.memory_space<vmem>>, %arg6: memref<2x8x256xf32, #tpu.memory_space<vmem>>) attributes {dimension_semantics = [#tpu.dimension_semantics<parallel>], iteration_bounds = array<i64: 4>, scalar_prefetch = 0 : i64, scratch_operands = 0 : i64, tpu.core_type = #tpu.core_type<tc>, window_params = [{transform_indices = @transform_0, window_bounds = array<i64: 8, 512>}, {pipeline_mode = #tpu.pipeline_mode<synchronous>, transform_indices = @transform_1, window_bounds = array<i64: 8, 56>}, {pipeline_mode = #tpu.pipeline_mode<synchronous>, transform_indices = @transform_2, window_bounds = array<i64: 8, 1>}, {pipeline_mode = #tpu.pipeline_mode<synchronous>, transform_indices = @transform_3, window_bounds = array<i64: 8, 48>}, {pipeline_mode = #tpu.pipeline_mode<synchronous>, transform_indices = @transform_4, window_bounds = array<i64: 8, 1>}, {transform_indices = @transform_5, window_bounds = array<i64: 2, 8, 256>}]} {
    %c0 = arith.constant 0 : index
    %c0_0 = arith.constant 0 : index
    %0 = vector.load %arg2[%c0, %c0_0] : memref<8x56xbf16, #tpu.memory_space<vmem>>, vector<8x56xbf16>
    %c0_1 = arith.constant 0 : index
    %c0_2 = arith.constant 0 : index
    %1 = vector.load %arg4[%c0_1, %c0_2] : memref<8x48xbf16, #tpu.memory_space<vmem>>, vector<8x48xbf16>
    %c0_3 = arith.constant 0 : index
    %c0_4 = arith.constant 0 : index
    %2 = vector.load %arg3[%c0_3, %c0_4] : memref<8x1xf32, #tpu.memory_space<vmem>>, vector<8x1xf32>
    %c0_5 = arith.constant 0 : index
    %c0_6 = arith.constant 0 : index
    %3 = vector.load %arg5[%c0_5, %c0_6] : memref<8x1xf32, #tpu.memory_space<vmem>>, vector<8x1xf32>
    %c0_7 = arith.constant 0 : index
    %c0_8 = arith.constant 0 : index
    %4 = vector.load %arg1[%c0_7, %c0_8] : memref<8x512xbf16, #tpu.memory_space<vmem>>, vector<8x512xbf16>
    %5 = arith.extf %4 : vector<8x512xbf16> to vector<8x512xf32>
    %6 = tpu.iota {dimensions = array<i32: 1>} : vector<1x512xi32>
    %c256_i32 = arith.constant 256 : i32
    %c0_i32 = arith.constant 0 : i32
    %7 = arith.cmpi eq, %c256_i32, %c0_i32 : i32
    %c1_i32 = arith.constant 1 : i32
    %8 = arith.select %7, %c1_i32, %c256_i32 : i32
    %9 = vector.broadcast %8 : i32 to vector<1x512xi32>
    %10 = arith.remsi %6, %9 : vector<1x512xi32>
    %c0_i32_9 = arith.constant 0 : i32
    %11 = vector.broadcast %c0_i32_9 : i32 to vector<1x512xi32>
    %12 = arith.cmpi ne, %10, %11 : vector<1x512xi32>
    %c0_i32_10 = arith.constant 0 : i32
    %13 = vector.broadcast %c0_i32_10 : i32 to vector<1x512xi32>
    %14 = arith.cmpi slt, %10, %13 : vector<1x512xi32>
    %c0_i32_11 = arith.constant 0 : i32
    %15 = arith.cmpi slt, %8, %c0_i32_11 : i32
    %16 = vector.broadcast %15 : i1 to vector<1x512xi1>
    %17 = vector.broadcast %16 : vector<1x512xi1> to vector<1x512xi1>
    %18 = arith.xori %14, %17 : vector<1x512xi1>
    %19 = arith.andi %18, %12 : vector<1x512xi1>
    %20 = vector.broadcast %8 : i32 to vector<1x512xi32>
    %21 = arith.addi %10, %20 : vector<1x512xi32>
    %22 = arith.select %19, %21, %10 : vector<1x512xi1>, vector<1x512xi32>
    %c3_i32 = arith.constant 3 : i32
    %23 = tpu.dynamic_rotate %5 by %c3_i32 dim 1 : vector<8x512xf32>, i32 -> vector<8x512xf32>
    %c259_i32 = arith.constant 259 : i32
    %24 = tpu.dynamic_rotate %5 by %c259_i32 dim 1 : vector<8x512xf32>, i32 -> vector<8x512xf32>
    %c3_i32_12 = arith.constant 3 : i32
    %25 = vector.broadcast %c3_i32_12 : i32 to vector<1x512xi32>
    %26 = arith.cmpi slt, %22, %25 : vector<1x512xi32>
    %27 = vector.shape_cast %26 : vector<1x512xi1> to vector<1x512xi1>
    %28 = vector.broadcast %27 : vector<1x512xi1> to vector<8x512xi1>
    %29 = arith.select %28, %24, %23 : vector<8x512xi1>, vector<8x512xf32>
    %c2_i32 = arith.constant 2 : i32
    %30 = tpu.dynamic_rotate %5 by %c2_i32 dim 1 : vector<8x512xf32>, i32 -> vector<8x512xf32>
    %c258_i32 = arith.constant 258 : i32
    %31 = tpu.dynamic_rotate %5 by %c258_i32 dim 1 : vector<8x512xf32>, i32 -> vector<8x512xf32>
    %c2_i32_13 = arith.constant 2 : i32
    %32 = vector.broadcast %c2_i32_13 : i32 to vector<1x512xi32>
    %33 = arith.cmpi slt, %22, %32 : vector<1x512xi32>
    %34 = vector.shape_cast %33 : vector<1x512xi1> to vector<1x512xi1>
    %35 = vector.broadcast %34 : vector<1x512xi1> to vector<8x512xi1>
    %36 = arith.select %35, %31, %30 : vector<8x512xi1>, vector<8x512xf32>
    %c1_i32_14 = arith.constant 1 : i32
    %37 = tpu.dynamic_rotate %5 by %c1_i32_14 dim 1 : vector<8x512xf32>, i32 -> vector<8x512xf32>
    %c257_i32 = arith.constant 257 : i32
    %38 = tpu.dynamic_rotate %5 by %c257_i32 dim 1 : vector<8x512xf32>, i32 -> vector<8x512xf32>
    %c1_i32_15 = arith.constant 1 : i32
    %39 = vector.broadcast %c1_i32_15 : i32 to vector<1x512xi32>
    %40 = arith.cmpi slt, %22, %39 : vector<1x512xi32>
    %41 = vector.shape_cast %40 : vector<1x512xi1> to vector<1x512xi1>
    %42 = vector.broadcast %41 : vector<1x512xi1> to vector<8x512xi1>
    %43 = arith.select %42, %38, %37 : vector<8x512xi1>, vector<8x512xf32>
    %c255_i32 = arith.constant 255 : i32
    %44 = tpu.dynamic_rotate %5 by %c255_i32 dim 1 : vector<8x512xf32>, i32 -> vector<8x512xf32>
    %c511_i32 = arith.constant 511 : i32
    %45 = tpu.dynamic_rotate %5 by %c511_i32 dim 1 : vector<8x512xf32>, i32 -> vector<8x512xf32>
    %c255_i32_16 = arith.constant 255 : i32
    %46 = vector.broadcast %c255_i32_16 : i32 to vector<1x512xi32>
    %47 = arith.cmpi slt, %22, %46 : vector<1x512xi32>
    %48 = vector.shape_cast %47 : vector<1x512xi1> to vector<1x512xi1>
    %49 = vector.broadcast %48 : vector<1x512xi1> to vector<8x512xi1>
    %50 = arith.select %49, %45, %44 : vector<8x512xi1>, vector<8x512xf32>
    %c254_i32 = arith.constant 254 : i32
    %51 = tpu.dynamic_rotate %5 by %c254_i32 dim 1 : vector<8x512xf32>, i32 -> vector<8x512xf32>
    %c510_i32 = arith.constant 510 : i32
    %52 = tpu.dynamic_rotate %5 by %c510_i32 dim 1 : vector<8x512xf32>, i32 -> vector<8x512xf32>
    %c254_i32_17 = arith.constant 254 : i32
    %53 = vector.broadcast %c254_i32_17 : i32 to vector<1x512xi32>
    %54 = arith.cmpi slt, %22, %53 : vector<1x512xi32>
    %55 = vector.shape_cast %54 : vector<1x512xi1> to vector<1x512xi1>
    %56 = vector.broadcast %55 : vector<1x512xi1> to vector<8x512xi1>
    %57 = arith.select %56, %52, %51 : vector<8x512xi1>, vector<8x512xf32>
    %c253_i32 = arith.constant 253 : i32
    %58 = tpu.dynamic_rotate %5 by %c253_i32 dim 1 : vector<8x512xf32>, i32 -> vector<8x512xf32>
    %c509_i32 = arith.constant 509 : i32
    %59 = tpu.dynamic_rotate %5 by %c509_i32 dim 1 : vector<8x512xf32>, i32 -> vector<8x512xf32>
    %c253_i32_18 = arith.constant 253 : i32
    %60 = vector.broadcast %c253_i32_18 : i32 to vector<1x512xi32>
    %61 = arith.cmpi slt, %22, %60 : vector<1x512xi32>
    %62 = vector.shape_cast %61 : vector<1x512xi1> to vector<1x512xi1>
    %63 = vector.broadcast %62 : vector<1x512xi1> to vector<8x512xi1>
    %64 = arith.select %63, %59, %58 : vector<8x512xi1>, vector<8x512xf32>
    %65 = tpu.concatenate %29, %36, %43, %5, %50, %57, %64 in 0 : vector<8x512xf32>, vector<8x512xf32>, vector<8x512xf32>, vector<8x512xf32>, vector<8x512xf32>, vector<8x512xf32>, vector<8x512xf32> -> vector<56x512xf32>
    %66 = arith.truncf %65 : vector<56x512xf32> to vector<56x512xbf16>
    %cst = arith.constant dense<0.000000e+00> : vector<8x512xf32>
    %67 = tpu.matmul %0, %66, %cst {dimension_numbers = #tpu.dot_dimension_numbers<[1], [0], [0], [1], [0, 0, 1, 1], [], []>} : vector<8x56xbf16>, vector<56x512xbf16>, vector<8x512xf32> -> vector<8x512xf32>
    %68 = vector.broadcast %2 : vector<8x1xf32> to vector<8x512xf32>
    %69 = arith.addf %67, %68 : vector<8x512xf32>
    %cst_19 = arith.constant 0.000000e+00 : f32
    %70 = vector.broadcast %cst_19 : f32 to vector<8x512xf32>
    %71 = arith.cmpf oge, %69, %70 : vector<8x512xf32>
    %cst_20 = arith.constant 0.00999999977 : f32
    %72 = vector.broadcast %cst_20 : f32 to vector<8x512xf32>
    %73 = arith.mulf %72, %69 : vector<8x512xf32>
    %74 = arith.select %71, %69, %73 : vector<8x512xi1>, vector<8x512xf32>
    %c2_i32_21 = arith.constant 2 : i32
    %75 = tpu.dynamic_rotate %74 by %c2_i32_21 dim 1 : vector<8x512xf32>, i32 -> vector<8x512xf32>
    %c258_i32_22 = arith.constant 258 : i32
    %76 = tpu.dynamic_rotate %74 by %c258_i32_22 dim 1 : vector<8x512xf32>, i32 -> vector<8x512xf32>
    %c2_i32_23 = arith.constant 2 : i32
    %77 = vector.broadcast %c2_i32_23 : i32 to vector<1x512xi32>
    %78 = arith.cmpi slt, %22, %77 : vector<1x512xi32>
    %79 = vector.shape_cast %78 : vector<1x512xi1> to vector<1x512xi1>
    %80 = vector.broadcast %79 : vector<1x512xi1> to vector<8x512xi1>
    %81 = arith.select %80, %76, %75 : vector<8x512xi1>, vector<8x512xf32>
    %c1_i32_24 = arith.constant 1 : i32
    %82 = tpu.dynamic_rotate %74 by %c1_i32_24 dim 1 : vector<8x512xf32>, i32 -> vector<8x512xf32>
    %c257_i32_25 = arith.constant 257 : i32
    %83 = tpu.dynamic_rotate %74 by %c257_i32_25 dim 1 : vector<8x512xf32>, i32 -> vector<8x512xf32>
    %c1_i32_26 = arith.constant 1 : i32
    %84 = vector.broadcast %c1_i32_26 : i32 to vector<1x512xi32>
    %85 = arith.cmpi slt, %22, %84 : vector<1x512xi32>
    %86 = vector.shape_cast %85 : vector<1x512xi1> to vector<1x512xi1>
    %87 = vector.broadcast %86 : vector<1x512xi1> to vector<8x512xi1>
    %88 = arith.select %87, %83, %82 : vector<8x512xi1>, vector<8x512xf32>
    %c255_i32_27 = arith.constant 255 : i32
    %89 = tpu.dynamic_rotate %74 by %c255_i32_27 dim 1 : vector<8x512xf32>, i32 -> vector<8x512xf32>
    %c511_i32_28 = arith.constant 511 : i32
    %90 = tpu.dynamic_rotate %74 by %c511_i32_28 dim 1 : vector<8x512xf32>, i32 -> vector<8x512xf32>
    %c255_i32_29 = arith.constant 255 : i32
    %91 = vector.broadcast %c255_i32_29 : i32 to vector<1x512xi32>
    %92 = arith.cmpi slt, %22, %91 : vector<1x512xi32>
    %93 = vector.shape_cast %92 : vector<1x512xi1> to vector<1x512xi1>
    %94 = vector.broadcast %93 : vector<1x512xi1> to vector<8x512xi1>
    %95 = arith.select %94, %90, %89 : vector<8x512xi1>, vector<8x512xf32>
    %c254_i32_30 = arith.constant 254 : i32
    %96 = tpu.dynamic_rotate %74 by %c254_i32_30 dim 1 : vector<8x512xf32>, i32 -> vector<8x512xf32>
    %c510_i32_31 = arith.constant 510 : i32
    %97 = tpu.dynamic_rotate %74 by %c510_i32_31 dim 1 : vector<8x512xf32>, i32 -> vector<8x512xf32>
    %c254_i32_32 = arith.constant 254 : i32
    %98 = vector.broadcast %c254_i32_32 : i32 to vector<1x512xi32>
    %99 = arith.cmpi slt, %22, %98 : vector<1x512xi32>
    %100 = vector.shape_cast %99 : vector<1x512xi1> to vector<1x512xi1>
    %101 = vector.broadcast %100 : vector<1x512xi1> to vector<8x512xi1>
    %102 = arith.select %101, %97, %96 : vector<8x512xi1>, vector<8x512xf32>
    %103 = tpu.concatenate %81, %88, %74, %95, %102 in 0 : vector<8x512xf32>, vector<8x512xf32>, vector<8x512xf32>, vector<8x512xf32>, vector<8x512xf32> -> vector<40x512xf32>
    %104 = tpu.concatenate %103, %5 in 0 : vector<40x512xf32>, vector<8x512xf32> -> vector<48x512xf32>
    %105 = arith.truncf %104 : vector<48x512xf32> to vector<48x512xbf16>
    %cst_33 = arith.constant dense<0.000000e+00> : vector<8x512xf32>
    %106 = tpu.matmul %1, %105, %cst_33 {dimension_numbers = #tpu.dot_dimension_numbers<[1], [0], [0], [1], [0, 0, 1, 1], [], []>} : vector<8x48xbf16>, vector<48x512xbf16>, vector<8x512xf32> -> vector<8x512xf32>
    %107 = vector.broadcast %3 : vector<8x1xf32> to vector<8x512xf32>
    %108 = arith.addf %106, %107 : vector<8x512xf32>
    %cst_34 = arith.constant 0.000000e+00 : f32
    %109 = vector.broadcast %cst_34 : f32 to vector<8x512xf32>
    %110 = arith.cmpf oge, %108, %109 : vector<8x512xf32>
    %cst_35 = arith.constant 0.00999999977 : f32
    %111 = vector.broadcast %cst_35 : f32 to vector<8x512xf32>
    %112 = arith.mulf %111, %108 : vector<8x512xf32>
    %113 = arith.select %110, %108, %112 : vector<8x512xi1>, vector<8x512xf32>
    %114 = vector.extract_strided_slice %113 {offsets = [0, 0], sizes = [8, 256], strides = [1, 1]} : vector<8x512xf32> to vector<8x256xf32>
    %c0_36 = arith.constant 0 : index
    %c0_37 = arith.constant 0 : index
    %c0_38 = arith.constant 0 : index
    %115 = vector.load %arg6[%c0_36, %c0_37, %c0_38] : memref<2x8x256xf32, #tpu.memory_space<vmem>>, vector<1x8x256xf32>
    %116 = vector.shape_cast %115 : vector<1x8x256xf32> to vector<8x256xf32>
    %117 = vector.shape_cast %114 : vector<8x256xf32> to vector<1x8x256xf32>
    tpu.vector_store %arg6[%c0_36, %c0_37, %c0_38], %117 {strides = array<i32>} : memref<2x8x256xf32, #tpu.memory_space<vmem>>, vector<1x8x256xf32>,
    %118 = vector.extract_strided_slice %113 {offsets = [0, 256], sizes = [8, 256], strides = [1, 1]} : vector<8x512xf32> to vector<8x256xf32>
    %c1 = arith.constant 1 : index
    %c0_39 = arith.constant 0 : index
    %c0_40 = arith.constant 0 : index
    %119 = vector.load %arg6[%c1, %c0_39, %c0_40] : memref<2x8x256xf32, #tpu.memory_space<vmem>>, vector<1x8x256xf32>
    %120 = vector.shape_cast %119 : vector<1x8x256xf32> to vector<8x256xf32>
    %121 = vector.shape_cast %118 : vector<8x256xf32> to vector<1x8x256xf32>
    tpu.vector_store %arg6[%c1, %c0_39, %c0_40], %121 {strides = array<i32>} : memref<2x8x256xf32, #tpu.memory_space<vmem>>, vector<1x8x256xf32>,
    return
  }
  func.func @transform_0(%arg0: i32) -> (i32, i32) {
    %c0_i32 = arith.constant 0 : i32
    %c0_i32_0 = arith.constant 0 : i32
    return %c0_i32, %arg0 : i32, i32
  }
  func.func @transform_1(%arg0: i32) -> (i32, i32) {
    %c0_i32 = arith.constant 0 : i32
    %c0_i32_0 = arith.constant 0 : i32
    %c0_i32_1 = arith.constant 0 : i32
    return %c0_i32, %c0_i32_0 : i32, i32
  }
  func.func @transform_2(%arg0: i32) -> (i32, i32) {
    %c0_i32 = arith.constant 0 : i32
    %c0_i32_0 = arith.constant 0 : i32
    %c0_i32_1 = arith.constant 0 : i32
    return %c0_i32, %c0_i32_0 : i32, i32
  }
  func.func @transform_3(%arg0: i32) -> (i32, i32) {
    %c0_i32 = arith.constant 0 : i32
    %c0_i32_0 = arith.constant 0 : i32
    %c0_i32_1 = arith.constant 0 : i32
    return %c0_i32, %c0_i32_0 : i32, i32
  }
  func.func @transform_4(%arg0: i32) -> (i32, i32) {
    %c0_i32 = arith.constant 0 : i32
    %c0_i32_0 = arith.constant 0 : i32
    %c0_i32_1 = arith.constant 0 : i32
    return %c0_i32, %c0_i32_0 : i32, i32
  }
  func.func @transform_5(%arg0: i32) -> (i32, i32, i32) {
    %c0_i32 = arith.constant 0 : i32
    %c0_i32_0 = arith.constant 0 : i32
    %c0_i32_1 = arith.constant 0 : i32
    return %arg0, %c0_i32, %c0_i32_0 : i32, i32, i32
  }
}

</mosaic_0001>

<bundles_post_ra>
// kernel: _lambda_.1
= control target key start
LH: loop header
LB: loop body
LE: loop exit
PB: predicated region body
PF: predicated region fallthrough
CT: control target
= control target key end

     0   :  { %10 = vsyncpa [#allocation3], 0  ;;  %s1464_s0 = inlined_call_operand.vmem [shape: bf16[8,2048], index: 0, kind: input, shape index: {}]   ;;  %s1465_s1 = inlined_call_operand.vmem [shape: bf16[8,56], index: 1, kind: input, shape index: {}]   ;;  %s1466_s2 = inlined_call_operand.vmem [shape: f32[8,1], index: 2, kind: input, shape index: {}]   ;;  %s1467_s3 = inlined_call_operand.vmem [shape: bf16[8,48], index: 3, kind: input, shape index: {}]   ;;  %s1468_s4 = inlined_call_operand.vmem [shape: f32[8,1], index: 4, kind: input, shape index: {}]   ;;  %s1469_s5 = inlined_call_operand.hbm [shape: f32[8,8,256], index: 5, kind: output, shape index: {}]  }
   0x1   :  { %12 = vsyncpa [#allocation3 + $0x1], 0  ;;  %s1133_s18 = smov 0   ;;  %s1135_s19 = smov 0  }
   0x2   :  { %s1137_s20 = smov 0   ;;  %s1139_s21 = smov 0  }
   0x3 LB: > { %s1154_s22 = sadd.s32 4294967295, %s1091_s21   ;;  %s857_s23 = sadd.s32 4294967294, %s1091_s21   ;;  %s1091_s21 = sphi %s1139_s21, %s1475_s21   ;;  %s1087_s20 = sphi %s1137_s20, %s1474_s20   ;;  %s1083_s19 = sphi %s1135_s19, %s1473_s19   ;;  %s1079_s18 = sphi %s1133_s18, %s1472_s18  }
   0x4   : > { %s1158_s24 = sadd.s32 1, %s1091_s21   ;;  %s135_s25 = sadd.s32 1, %s1087_s20 }
   0x5   : > { %s132_s26 = ssub.s32 %s1091_s21, %s1158_s24  ;;  %p145_p0 = scmp.ne.s32.totalorder %s1087_s20, %s1083_s19 }
   0x6   : > { %p133_p1 = scmp.eq.s32.totalorder %s132_s26, 0  ;;  %p146_p2 = scmp.eq.s32.totalorder %s1154_s22, 3 }
   0x7   : > { %p151_p3 = scmp.ne.s32.totalorder %s1083_s19, %s1079_s18  ;;  %p152_p4 = scmp.eq.s32.totalorder %s857_s23, 3 }
   0x8   : > { %s1169_s27 = scalar_select %p133_p1, %s1087_s20, %s135_s25  }
   0x9   : > { %p1171_p5 = por %p146_p2, %p145_p0  ;;  %p1175_p6 = por %p152_p4, %p151_p3 }
   0xa   : > { %p860_p7 = scmp.ge.s32.totalorder %s1091_s21, 1  ;;  %p191_p8 = scmp.lt.s32.totalorder %s1091_s21, 5 }
   0xc   : > { %p192_p9 = pnand %p860_p7, %p191_p8 }
   0xd   : > { %s862_s30 = sshll.u32 (!%p192_p9), %s1154_s22, 2  ;;  %s1093_s10 = smov (!%p192_p9), 2   ;;  %v1098_v8 = vmov (!%p192_p9), 0   ;;  %v229_v9 = vld [vmem:[%s1466_s2] sm:$0xff] (!%p192_p9)  ;;  %v237_v10 = vlaneseq (!%p192_p9) }
   0xe   : > { %195 = sbr.rel (%p192_p9) target bundleno = 769 (0x301), region = 40  ;;  %p220_p10 = scmp.lt.s32.totalorder (!%p192_p9), %s862_s30, 15  ;;  %534 = vmatprep.mubr.bf16.mxu0 (!%p192_p9), %v1098_v8  ;;  %575 = vmatprep.mubr.bf16.mxu1 (!%p192_p9), %v1098_v8 }
   0xf   : > { %s1094_s11 = smov (!%p192_p9), 3   ;;  %s1095_s12 = smov (!%p192_p9), 1   ;;  %988 = vset.pattern.permute.xlu0 (!%p192_p9), %v1098_v8  ;;  %v1211_v11 = vand.u32 (!%p192_p9), 127, %v237_v10 }
  0x10   : > { %s1096_s13 = smov (!%p192_p9), 127   ;;  %s1097_s14 = smov (!%p192_p9), 126  }
  0x11   : > { %s1099_s15 = smov (!%p192_p9), 125   ;;  %v240_v12 = vadd.s32 (!%p192_p9), 256, %v1211_v11  ;;  %v1215_v13 = vand.u32 (!%p192_p9), 255, %v1211_v11  ;;  %vm298_vm0 = vcmp.lt.s32.totalorder (!%p192_p9), %v1211_v11, 3  ;;  %vm327_vm1 = vcmp.lt.s32.totalorder (!%p192_p9), %v1211_v11, 2  ;;  %s216_s8 = sand.u32 (!%p192_p9), 1, %s1083_s19  }
  0x12   : > { %v239_v21 = vadd.s32 (!%p192_p9), 128, %v1211_v11  ;;  %vm356_vm4 = vcmp.lt.s32.totalorder (!%p192_p9), %v1211_v11, 1  ;;  %vm385_vm7 = vcmp.lt.s32.totalorder (!%p192_p9), %v1211_v11, 127  ;;  %v241_v32 = vadd.s32 (!%p192_p9), 384, %v1211_v11  ;;  %s1100_s17 = smov (!%p192_p9), [#allocation2]  }
  0x13   : > { %v1219_v16 = vand.u32 (!%p192_p9), 255, %v240_v12  ;;  %vm303_vm2 = vcmp.lt.s32.totalorder (!%p192_p9), %v1215_v13, 3  ;;  %vm332_vm3 = vcmp.lt.s32.totalorder (!%p192_p9), %v1215_v13, 2  ;;  %vm361_vm8 = vcmp.lt.s32.totalorder (!%p192_p9), %v1215_v13, 1  ;;  %s1033_s23 = sshll.u32 (!%p192_p9), %s1100_s17, 4  ;;  %s1034_s23 = int_to_ptr.vmem [resolvable:$false] %s1033_s23 }
  0x14   : > { %v1234_v31 = vand.u32 (!%p192_p9), 255, %v239_v21  ;;  %vm414_vm10 = vcmp.lt.s32.totalorder (!%p192_p9), %v1211_v11, 126  ;;  %v1258_v50 = vand.u32 (!%p192_p9), 255, %v241_v32  ;;  %vm443_vm11 = vcmp.lt.s32.totalorder (!%p192_p9), %v1211_v11, 125  ;;  %s1035_s25 = scalar_lea.vmem (!%p192_p9), %s1034_s23, 1024 }
  0x15   : > { %s1477_s30 = smov (!%p220_p10, %s862_s30), 15  ;;  %vm305_vm5 = vcmp.lt.s32.totalorder %v1219_v16, 3  ;;  %vm334_vm6 = vcmp.lt.s32.totalorder %v1219_v16, 2  ;;  %vm363_vm9 = vcmp.lt.s32.totalorder %v1219_v16, 1 }
  0x16   : > { %s863_s6 = sshll.u32 %s1477_s30, 2  ;;  %vm391_vm12 = vcmp.lt.s32.totalorder %v1234_v31, 255  ;;  %vm420_vm13 = vcmp.lt.s32.totalorder %v1234_v31, 254  ;;  %vm393_vm14 = vcmp.lt.s32.totalorder %v1258_v50, 255  ;;  %vm422_vm15 = vcmp.lt.s32.totalorder %v1258_v50, 254 }
  0x17   : > { %s223_s9 = scalar_lea.vmem %s1464_s0, %s863_s6 }
  0x18   : > { %v231_v0 = vld [vmem:[%s223_s9] sm:$0xff]  ;;  %v232_v1 = vld [vmem:[%s223_s9 + $0x8] sm:$0xff]  ;;  %s861_s9 = sshll.u32 %s216_s8, 5 }
  0x19   : > { %v1185_v2 = vunpack.c.l.bf16 %v231_v0  ;;  %v1187_v3 = vunpack.c.h.bf16 %v231_v0  ;;  %v1189_v4 = vunpack.c.l.bf16 %v232_v1  ;;  %v1191_v5 = vunpack.c.h.bf16 %v232_v1 }
  0x1b   : > { %v938_v6 = vpack.i.bf16 %v1187_v3, %v1185_v2  ;;  %v943_v7 = vpack.i.bf16 %v1191_v5, %v1189_v4 }
  0x1d   : > { %939 = vrot.lane.b32.xlu1 %v938_v6, %s1093_s10  ;;  %929 = vrot.lane.b32.xlu0 %v938_v6, %s1094_s11 }
  0x21   : > { %944 = vrot.lane.b32.xlu1 %v943_v7, %s1093_s10  ;;  %934 = vrot.lane.b32.xlu0 %v943_v7, %s1094_s11 }
  0x25   : > { %954 = vrot.lane.b32.xlu1 %v943_v7, %s1095_s12  ;;  %949 = vrot.lane.b32.xlu0 %v938_v6, %s1095_s12 }
  0x29   : > { %964 = vrot.lane.b32.xlu1 %v943_v7, %s1096_s13  ;;  %959 = vrot.lane.b32.xlu0 %v938_v6, %s1096_s13 }
  0x2d   : > { %974 = vrot.lane.b32.xlu1 %v943_v7, %s1097_s14  ;;  %969 = vrot.lane.b32.xlu0 %v938_v6, %s1097_s14 }
  0x31   : > { %984 = vrot.lane.b32.xlu1 %v943_v7, %s1099_s15  ;;  %979 = vrot.lane.b32.xlu0 %v938_v6, %s1099_s15  ;;  %s1423_s15 = scalar_lea.sflag [#allocation3], %s216_s8 }
  0x35   : > { %482 = vperm.xlu0 %988, %v229_v9  }
  0x8f   : > { %v940_v14 = vpop.permute.xlu1 %939  ;;  %v930_v15 = vpop.permute.xlu0 %929 }
  0x90   : > { %v942_v17 = vunpack.i.h.bf16 %v940_v14  ;;  %v941_v18 = vunpack.i.l.bf16 %v940_v14  ;;  %v932_v19 = vunpack.i.h.bf16 %v930_v15  ;;  %v931_v20 = vunpack.i.l.bf16 %v930_v15 }
  0x92   : > { %v301_v22 = vsel %vm298_vm0, %v931_v20, %v932_v19  ;;  %v330_v23 = vsel %vm327_vm1, %v941_v18, %v942_v17 }
  0x93   : > { %v945_v24 = vpop.permute.xlu1 %944  ;;  %v935_v25 = vpop.permute.xlu0 %934  ;;  %v465_v26 = vpack.c.bf16 %v330_v23, %v301_v22 }
  0x94   : > { %v947_v27 = vunpack.i.h.bf16 %v945_v24  ;;  %v946_v28 = vunpack.i.l.bf16 %v945_v24  ;;  %v937_v29 = vunpack.i.h.bf16 %v935_v25  ;;  %v936_v30 = vunpack.i.l.bf16 %v935_v25 }
  0x95   : > { %502 = vmatprep.subr.bf16.mxu0 %v465_v26 }
  0x96   : > { %v299_v33 = vsel %vm298_vm0, %v936_v30, %v937_v29  ;;  %v328_v34 = vsel %vm327_vm1, %v946_v28, %v947_v27  ;;  %v300_v35 = vsel %vm298_vm0, %v932_v19, %v936_v30  ;;  %v302_v36 = vsel %vm298_vm0, %v937_v29, %v931_v20 }
  0x97   : > { %v955_v37 = vpop.permute.xlu1 %954  ;;  %v950_v38 = vpop.permute.xlu0 %949  ;;  %v467_v39 = vpack.c.bf16 %v328_v34, %v299_v33  ;;  %v315_v40 = vsel %vm303_vm2, %v300_v35, %v302_v36  ;;  %v329_v41 = vsel %vm327_vm1, %v942_v17, %v946_v28  ;;  %v331_v42 = vsel %vm327_vm1, %v947_v27, %v941_v18 }
  0x98   : > { %v957_v43 = vunpack.i.h.bf16 %v955_v37  ;;  %v956_v44 = vunpack.i.l.bf16 %v955_v37  ;;  %v952_v45 = vunpack.i.h.bf16 %v950_v38  ;;  %v951_v46 = vunpack.i.l.bf16 %v950_v38 }
  0x99   : > { %543 = vmatprep.subr.bf16.mxu1 %v467_v39  ;;  %v344_v47 = vsel %vm332_vm3, %v329_v41, %v331_v42  ;;  %v317_v48 = vsel %vm305_vm5, %v302_v36, %v300_v35  ;;  %v346_v49 = vsel %vm334_vm6, %v331_v42, %v329_v41  ;;  %vm449_vm0 = vcmp.lt.s32.totalorder %v1234_v31, 253  ;;  %v228_v31 = vld [vmem:[%s1467_s3] sm:$0xf] }
  0x9a   : > { %v358_v51 = vsel %vm356_vm4, %v952_v45, %v956_v44  ;;  %v360_v52 = vsel %vm356_vm4, %v957_v43, %v951_v46  ;;  %v464_v53 = vpack.c.bf16 %v344_v47, %v315_v40  ;;  %v466_v54 = vpack.c.bf16 %v346_v49, %v317_v48 }
  0x9b   : > { %v965_v55 = vpop.permute.xlu1 %964  ;;  %v960_v56 = vpop.permute.xlu0 %959  ;;  %v359_v57 = vsel %vm356_vm4, %v951_v46, %v952_v45  ;;  %v357_v58 = vsel %vm356_vm4, %v956_v44, %v957_v43  ;;  %v373_v59 = vsel %vm361_vm8, %v358_v51, %v360_v52  ;;  %v375_v60 = vsel %vm363_vm9, %v360_v52, %v358_v51 }
  0x9c   : > { %503 = vmatpush1.bf16.msra.mxu0 %v464_v53  ;;  %544 = vmatpush1.bf16.msra.mxu1 %v466_v54  ;;  %v967_v61 = vunpack.i.h.bf16 %v965_v55  ;;  %v966_v62 = vunpack.i.l.bf16 %v965_v55  ;;  %v962_v63 = vunpack.i.h.bf16 %v960_v56  ;;  %v961_v0 = vunpack.i.l.bf16 %v960_v56  ;;  %v227_v55 = vld [vmem:[%s1465_s1] sm:$0xf] }
  0x9d   : > { %v469_v1 = vpack.c.bf16 %v1187_v3, %v359_v57  ;;  %v471_v6 = vpack.c.bf16 %v1191_v5, %v357_v58  ;;  %v468_v7 = vpack.c.bf16 %v1185_v2, %v373_v59  ;;  %v470_v9 = vpack.c.bf16 %v1189_v4, %v375_v60 }
  0x9e   : > { %v387_v10 = vsel %vm385_vm7, %v962_v63, %v966_v62  ;;  %v389_v12 = vsel %vm385_vm7, %v967_v61, %v961_v0  ;;  %v388_v21 = vsel %vm385_vm7, %v961_v0, %v962_v63  ;;  %v386_v22 = vsel %vm385_vm7, %v966_v62, %v967_v61 }
  0x9f   : > { %504 = vmatprep.subr.bf16.mxu0 %v469_v1  ;;  %545 = vmatprep.subr.bf16.mxu1 %v471_v6  ;;  %v975_v14 = vpop.permute.xlu1 %974  ;;  %v970_v15 = vpop.permute.xlu0 %969  ;;  %vm489_vm2 = vcmask 1043456   ;;  %vm451_vm5 = vcmp.lt.s32.totalorder %v1258_v50, 253  ;;  %v403_v29 = vsel %vm391_vm12, %v387_v10, %v389_v12  ;;  %v405_v32 = vsel %vm393_vm14, %v389_v12, %v387_v10 }
  0xa0   : > { %505 = vmatpush1.bf16.msra.mxu0 %v468_v7  ;;  %546 = vmatpush1.bf16.msra.mxu1 %v470_v9  ;;  %v977_v17 = vunpack.i.h.bf16 %v975_v14  ;;  %v976_v18 = vunpack.i.l.bf16 %v975_v14  ;;  %v972_v19 = vunpack.i.h.bf16 %v970_v15  ;;  %v971_v20 = vunpack.i.l.bf16 %v970_v15 }
  0xa2   : > { %v416_v23 = vsel %vm414_vm10, %v972_v19, %v976_v18  ;;  %v418_v24 = vsel %vm414_vm10, %v977_v17, %v971_v20  ;;  %v417_v25 = vsel %vm414_vm10, %v971_v20, %v972_v19  ;;  %v415_v26 = vsel %vm414_vm10, %v976_v18, %v977_v17 }
  0xa3   : > { %v985_v27 = vpop.permute.xlu1 %984  ;;  %v980_v28 = vpop.permute.xlu0 %979  ;;  %v432_v30 = vsel %vm420_vm13, %v416_v23, %v418_v24  ;;  %v434_v33 = vsel %vm422_vm15, %v418_v24, %v416_v23  ;;  %v472_v40 = vpack.c.bf16 %v417_v25, %v388_v21  ;;  %v474_v41 = vpack.c.bf16 %v415_v26, %v386_v22  ;;  %v230_v22 = vld [vmem:[%s1468_s4] sm:$0xff] }
  0xa4   : > { %v987_v34 = vunpack.i.h.bf16 %v985_v27  ;;  %v986_v35 = vunpack.i.l.bf16 %v985_v27  ;;  %v982_v36 = vunpack.i.h.bf16 %v980_v28  ;;  %v981_v37 = vunpack.i.l.bf16 %v980_v28 }
  0xa5   : > { %v473_v38 = vpack.c.bf16 %v432_v30, %v403_v29  ;;  %v475_v39 = vpack.c.bf16 %v434_v33, %v405_v32 }
  0xa6   : > { %v445_v42 = vsel %vm443_vm11, %v982_v36, %v986_v35  ;;  %v447_v43 = vsel %vm443_vm11, %v987_v34, %v981_v37  ;;  %v446_v44 = vsel %vm443_vm11, %v981_v37, %v982_v36  ;;  %v444_v45 = vsel %vm443_vm11, %v986_v35, %v987_v34 }
  0xa7   : > { %506 = vmatprep.subr.bf16.mxu0 %v473_v38  ;;  %547 = vmatprep.subr.bf16.mxu1 %v475_v39  ;;  %v461_v46 = vsel %vm449_vm0, %v445_v42, %v447_v43  ;;  %v463_v47 = vsel %vm451_vm5, %v447_v43, %v445_v42  ;;  %v476_v48 = vpack.c.bf16 %v446_v44, %v446_v44  ;;  %vm485_vm11 = vcmask 457728  }
  0xa8   : > { %507 = vmatpush1.bf16.msra.mxu0 %v472_v40  ;;  %548 = vmatpush1.bf16.msra.mxu1 %v474_v41  ;;  %v477_v49 = vpack.c.bf16 %v461_v46, %v461_v46  ;;  %v479_v51 = vpack.c.bf16 %v463_v47, %v463_v47  ;;  %v478_v52 = vpack.c.bf16 %v444_v45, %v444_v45 }
  0xa9   : > { %v491_v53 = vsel %vm489_vm2, %v476_v48, 0 }
  0xaa   : > { %864 = vmatprep.subr.msk.bf16.mxu0 %vm489_vm2, %v477_v49  ;;  %866 = vmatprep.subr.msk.bf16.mxu1 %vm489_vm2, %v479_v51  ;;  %v497_v54 = vsel %vm489_vm2, %v478_v52, 0 }
  0xac   : > { %509 = vmatpush1.bf16.msra.mxu0 %v491_v53  ;;  %550 = vmatpush1.bf16.msra.mxu1 %v497_v54 }
  0xaf   : > { %865 = vmatmul.mubr.msk.bf16.vlgmr.msra.gmra.mrb[0].mxu0 %vm485_vm11, %v227_v55  ;;  %867 = vmatmul.mubr.msk.bf16.vlgmr.msra.gmra.mrb[0].mxu1 %vm485_vm11, %v227_v55 }
  0xb0   : > { %713 = vmatprep.mubr.bf16.mxu0 %v1098_v8  ;;  %754 = vmatprep.mubr.bf16.mxu1 %v1098_v8 }
  0xb4   : > { %v483_v56 = vpop.permute.xlu0 %482 }
 0x182   : > { %v536_v57 = vpop.f32.mrb[0].mxu0  ;;  %v577_v58 = vpop.f32.mrb[0].mxu1 }
 0x183   : > { %v537_v59 = vadd.f32 %v536_v57, %v483_v56  ;;  %v578_v60 = vadd.f32 %v577_v58, %v483_v56  ;;  %v538_v61 = vpop.f32.mrb[1].mxu0  ;;  %v579_v62 = vpop.f32.mrb[1].mxu1 }
 0x184   : > { %v539_v63 = vadd.f32 %v538_v61, %v483_v56  ;;  %v580_v0 = vadd.f32 %v579_v62, %v483_v56  ;;  %v540_v1 = vpop.f32.mrb[2].mxu0  ;;  %v581_v6 = vpop.f32.mrb[2].mxu1 }
 0x185   : > { %vm584_vm0 = vcmp.ge.f32.partialorder %v537_v59, 0.0  ;;  %v588_v7 = vmul.f32 0.01, %v537_v59  ;;  %v590_v9 = vmul.f32 0.01, %v578_v60  ;;  %vm586_vm5 = vcmp.ge.f32.partialorder %v578_v60, 0.0 }
 0x186   : > { %vm585_vm2 = vcmp.ge.f32.partialorder %v539_v63, 0.0  ;;  %v589_v10 = vmul.f32 0.01, %v539_v63  ;;  %v591_v12 = vmul.f32 0.01, %v580_v0  ;;  %vm587_vm11 = vcmp.ge.f32.partialorder %v580_v0, 0.0 }
 0x187   : > { %v1328_v14 = vsel %vm584_vm0, %v537_v59, %v588_v7  ;;  %v541_v8 = vpop.f32.mrb[3].mxu0  ;;  %v582_v15 = vpop.f32.mrb[3].mxu1  ;;  %v1334_v19 = vsel %vm586_vm5, %v578_v60, %v590_v9 }
 0x188   : > { %v1330_v17 = vsel %vm585_vm2, %v539_v63, %v589_v10  ;;  %v1336_v20 = vsel %vm587_vm11, %v580_v0, %v591_v12 }
 0x189   : > { %v999_v18 = vpack.i.bf16 %v1330_v17, %v1328_v14  ;;  %v994_v21 = vpack.i.bf16 %v1336_v20, %v1334_v19 }
 0x18b   : > { %1000 = vrot.lane.b32.xlu0 %v999_v18, %s1095_s12  ;;  %990 = vrot.lane.b32.xlu1 %v999_v18, %s1093_s10 }
 0x18f   : > { %1010 = vrot.lane.b32.xlu0 %v999_v18, %s1096_s13  ;;  %995 = vrot.lane.b32.xlu1 %v994_v21, %s1093_s10  ;;  %s218_s10 = scalar_lea.vmem [#allocation2], %s861_s9 }
 0x190   : > { %s795_s11 = sshll.u32 %s218_s10, 4  ;;  %s1414_s11 = int_to_ptr.vmem [resolvable:$true] %s795_s11 }
 0x191   : > { %s1029_s16 = scalar_lea.vmem %s1414_s11, 512  ;;  %p1036_p0 = scmp.lt.s32.totalorder %s1414_s11, %s1034_s23 }
 0x192   : > { %p1030_p11 = scmp.ne.s32.totalorder %s1414_s11, %s1029_s16  ;;  %p1037_p1 = scmp.lt.s32.totalorder %s1035_s25, %s1029_s16 }
 0x193   : > { %1020 = vrot.lane.b32.xlu0 %v999_v18, %s1097_s14  ;;  %1005 = vrot.lane.b32.xlu1 %v994_v21, %s1095_s12  ;;  %s879_s12 = sshll.u32 %s1154_s22, 9 }
 0x194   : > { %p1031_p12 = pnand %p1030_p11, %p1171_p5  ;;  %p1038_p2 = por %p1037_p1, %p1036_p0 }
 0x196   : > { %p1032_p13 = pneg %p1031_p12 }
 0x197   : > { %674 = vperm.xlu0 %988, %v230_v22   ;;  %1015 = vrot.lane.b32.xlu1 %v994_v21, %s1096_s13 }
 0x198   : > { %p1039_p3 = pnand %p1038_p2, %p1032_p13 }
 0x19b   : > { %1025 = vrot.lane.b32.xlu1 %v994_v21, %s1097_s14  ;;  %s1419_s14 = scalar_lea.hbm %s1469_s5, %s879_s12 }
 0x1fd   : > { %v1001_v23 = vpop.permute.xlu0 %1000  ;;  %v991_v24 = vpop.permute.xlu1 %990 }
 0x1fe   : > { %v1003_v25 = vunpack.i.h.bf16 %v1001_v23  ;;  %v1002_v26 = vunpack.i.l.bf16 %v1001_v23  ;;  %v993_v27 = vunpack.i.h.bf16 %v991_v24  ;;  %v992_v28 = vunpack.i.l.bf16 %v991_v24 }
 0x200   : > { %v606_v29 = vsel %vm327_vm1, %v992_v28, %v993_v27  ;;  %v622_v30 = vsel %vm356_vm4, %v1002_v26, %v1003_v25 }
 0x201   : > { %v996_v32 = vpop.permute.xlu1 %995  ;;  %v661_v33 = vpack.c.bf16 %v622_v30, %v606_v29  ;;  %v1011_v34 = vpop.permute.xlu0 %1010 }
 0x202   : > { %v998_v35 = vunpack.i.h.bf16 %v996_v32  ;;  %v997_v36 = vunpack.i.l.bf16 %v996_v32  ;;  %v1013_v42 = vunpack.i.h.bf16 %v1011_v34  ;;  %v1012_v43 = vunpack.i.l.bf16 %v1011_v34 }
 0x203   : > { %681 = vmatprep.subr.bf16.mxu0 %v661_v33 }
 0x204   : > { %v605_v37 = vsel %vm327_vm1, %v993_v27, %v997_v36  ;;  %v607_v38 = vsel %vm327_vm1, %v998_v35, %v992_v28  ;;  %v604_v44 = vsel %vm327_vm1, %v997_v36, %v998_v35  ;;  %v638_v60 = vsel %vm385_vm7, %v1012_v43, %v1013_v42 }
 0x205   : > { %v1006_v39 = vpop.permute.xlu1 %1005  ;;  %v1021_v45 = vpop.permute.xlu0 %1020  ;;  %v608_v49 = vsel %vm332_vm3, %v605_v37, %v607_v38  ;;  %v610_v54 = vsel %vm334_vm6, %v607_v38, %v605_v37  ;;  %v664_v8 = vpack.c.bf16 %v638_v60, %v1328_v14  ;;  %vm677_vm1 = vcmask 392192  }
 0x206   : > { %v1008_v40 = vunpack.i.h.bf16 %v1006_v39  ;;  %v1007_v41 = vunpack.i.l.bf16 %v1006_v39  ;;  %v1023_v61 = vunpack.i.h.bf16 %v1021_v45  ;;  %v1022_v62 = vunpack.i.l.bf16 %v1021_v45 }
 0x208   : > { %v623_v46 = vsel %vm356_vm4, %v1008_v40, %v1002_v26  ;;  %v621_v47 = vsel %vm356_vm4, %v1003_v25, %v1007_v41  ;;  %v620_v48 = vsel %vm356_vm4, %v1007_v41, %v1008_v40  ;;  %v654_v15 = vsel %vm414_vm10, %v1022_v62, %v1023_v61 }
 0x209   : > { %v1016_v51 = vpop.permute.xlu1 %1015  ;;  %v663_v52 = vpack.c.bf16 %v620_v48, %v604_v44  ;;  %v624_v53 = vsel %vm361_vm8, %v621_v47, %v623_v46  ;;  %v626_v55 = vsel %vm363_vm9, %v623_v46, %v621_v47  ;;  %v668_v24 = vpack.c.bf16 %v1185_v2, %v654_v15 }
 0x20a   : > { %v1018_v56 = vunpack.i.h.bf16 %v1016_v51  ;;  %v1017_v57 = vunpack.i.l.bf16 %v1016_v51  ;;  %v660_v58 = vpack.c.bf16 %v624_v53, %v608_v49  ;;  %v662_v59 = vpack.c.bf16 %v626_v55, %v610_v54 }
 0x20b   : > { %722 = vmatprep.subr.bf16.mxu1 %v663_v52 }
 0x20c   : > { %v639_v13 = vsel %vm385_vm7, %v1018_v56, %v1012_v43  ;;  %v636_v63 = vsel %vm385_vm7, %v1017_v57, %v1018_v56  ;;  %v637_v16 = vsel %vm385_vm7, %v1013_v42, %v1017_v57  ;;  %682 = vmatpush1.bf16.msra.mxu0 %v660_v58  ;;  %723 = vmatpush1.bf16.msra.mxu1 %v662_v59 }
 0x20d   : > { %v1026_v0 = vpop.permute.xlu1 %1025  ;;  %v641_v1 = vsel %vm391_vm12, %v637_v16, %v639_v13  ;;  %v643_v6 = vsel %vm393_vm14, %v639_v13, %v637_v16  ;;  %v666_v18 = vpack.c.bf16 %v636_v63, %v1334_v19 }
 0x20e   : > { %v1028_v7 = vunpack.i.h.bf16 %v1026_v0  ;;  %v1027_v9 = vunpack.i.l.bf16 %v1026_v0  ;;  %v665_v10 = vpack.c.bf16 %v641_v1, %v1330_v17  ;;  %v667_v12 = vpack.c.bf16 %v643_v6, %v1336_v20 }
 0x210   : > { %v655_v21 = vsel %vm414_vm10, %v1028_v7, %v1022_v62  ;;  %v652_v22 = vsel %vm414_vm10, %v1027_v9, %v1028_v7  ;;  %v653_v23 = vsel %vm414_vm10, %v1023_v61, %v1027_v9  ;;  %683 = vmatprep.subr.bf16.mxu0 %v665_v10  ;;  %724 = vmatprep.subr.bf16.mxu1 %v667_v12 }
 0x211   : > { %684 = vmatpush1.bf16.msra.mxu0 %v664_v8  ;;  %725 = vmatpush1.bf16.msra.mxu1 %v666_v18  ;;  %v657_v14 = vsel %vm420_vm13, %v653_v23, %v655_v21  ;;  %v659_v17 = vsel %vm422_vm15, %v655_v21, %v653_v23  ;;  %v670_v11 = vpack.c.bf16 %v1189_v4, %v652_v22 }
 0x212   : > { %v669_v19 = vpack.c.bf16 %v1187_v3, %v657_v14  ;;  %v671_v20 = vpack.c.bf16 %v1191_v5, %v659_v17 }
 0x214   : > { %685 = vmatprep.subr.bf16.mxu0 %v669_v19  ;;  %726 = vmatprep.subr.bf16.mxu1 %v671_v20 }
 0x215   : > { %686 = vmatpush1.bf16.msra.mxu0 %v668_v24  ;;  %727 = vmatpush1.bf16.msra.mxu1 %v670_v11 }
 0x216   : > { %v675_v3 = vpop.permute.xlu0 %674 }
 0x218   : > { %868 = vmatmul.mubr.msk.bf16.vlgmr.msra.gmra.mrb[4].mxu0 %vm677_vm1, %v228_v31  ;;  %869 = vmatmul.mubr.msk.bf16.vlgmr.msra.gmra.mrb[4].mxu1 %vm677_vm1, %v228_v31 }
 0x2eb   : > { %v715_v5 = vpop.f32.mrb[4].mxu0  ;;  %v756_v2 = vpop.f32.mrb[4].mxu1 }
 0x2ec   : > { %v716_v50 = vadd.f32 %v715_v5, %v675_v3  ;;  %v757_v4 = vadd.f32 %v756_v2, %v675_v3  ;;  %v717_v25 = vpop.f32.mrb[5].mxu0  ;;  %v758_v26 = vpop.f32.mrb[5].mxu1 }
 0x2ed   : > { %v718_v27 = vadd.f32 %v717_v25, %v675_v3  ;;  %v759_v28 = vadd.f32 %v758_v26, %v675_v3  ;;  %v719_v29 = vpop.f32.mrb[6].mxu0  ;;  %v760_v30 = vpop.f32.mrb[6].mxu1 }
 0x2ee   : > { %vm763_vm3 = vcmp.ge.f32.partialorder %v716_v50, 0.0  ;;  %v767_v32 = vmul.f32 0.01, %v716_v50  ;;  %vm765_vm4 = vcmp.ge.f32.partialorder %v757_v4, 0.0  ;;  %v769_v33 = vmul.f32 0.01, %v757_v4 }
 0x2ef   : > { %vm764_vm6 = vcmp.ge.f32.partialorder %v718_v27, 0.0  ;;  %v768_v34 = vmul.f32 0.01, %v718_v27  ;;  %vm766_vm7 = vcmp.ge.f32.partialorder %v759_v28, 0.0  ;;  %v770_v35 = vmul.f32 0.01, %v759_v28 }
 0x2f0   : > { %v771_v36 = vsel %vm763_vm3, %v716_v50, %v767_v32  ;;  %v773_v37 = vsel %vm765_vm4, %v757_v4, %v769_v33  ;;  %v720_v38 = vpop.f32.mrb[7].mxu0  ;;  %v761_v39 = vpop.f32.mrb[7].mxu1 }
 0x2f1   : > { %775 = vst [vmem:[%s218_s10] sm:$0xff] %v771_v36  ;;  %870 = vst [vmem:[%s218_s10 + $0x10] sm:$0xff] %v773_v37  ;;  %v772_v40 = vsel %vm764_vm6, %v718_v27, %v768_v34  ;;  %v774_v41 = vsel %vm766_vm7, %v759_v28, %v770_v35 }
 0x2f2   : > { %776 = vst [vmem:[%s218_s10 + $0x8] sm:$0xff] %v772_v40  ;;  %871 = vst [vmem:[%s218_s10 + $0x18] sm:$0xff] %v774_v41 }
 0x2f3   : > { %1042 = shalt.err (!%p1039_p3)
}
 0x2f4   : > { %s1043_s26 = scalar_lea.hbm %s1419_s14, 512  ;;  %s1047_s7 = scalar_lea.hbm %s1469_s5, 2048 }
 0x2f5   : > { %p1044_p4 = scmp.ne.s32.totalorder %s1419_s14, %s1043_s26  ;;  %p1048_p9 = scmp.lt.u32.totalorder %s1419_s14, %s1469_s5 }
 0x2f6   : > { %p1049_p10 = scmp.lt.u32.totalorder %s1047_s7, %s1043_s26  ;;  %p1051_p12 = scmp.lt.u32.totalorder %s1043_s26, %s1419_s14 }
 0x2f7   : > { %p1045_p7 = pnand %p1044_p4, %p1171_p5 }
 0x2f8   : > { %p1050_p11 = por %p1049_p10, %p1048_p9 }
 0x2f9   : > { %p1046_p8 = pneg %p1045_p7 }
 0x2fa   : > { %p1052_p13 = por %p1051_p12, %p1050_p11 }
 0x2fc   : > { %p1053_p0 = pnand %p1052_p13, %p1046_p8 }
 0x2fe   : > { %1056 = shalt.err (!%p1053_p0)
}
 0x2ff   : > { %s1101_s10 = smov 256   ;;  %s1102_s12 = smov 16  }
 0x300   : > { %880 = dma.vmem_to_hbm [thread:$0]  (%p1171_p5), %s1414_s11, 512, %s1419_s14, %s1423_s15, %s1101_s10, %s1101_s10, %s1102_s12  }
 0x301 PF: > { %p886_p1 = scmp.ge.s32.totalorder %s1091_s21, 2  ;;  %s810_s13 = sand.u32 1, %s1079_s18  }
 0x302   : > { %s811_s22 = scalar_lea.sflag [#allocation3], %s810_s13 }
 0x303   : > { %p883_p2 = pnand %p886_p1, %p1175_p6 }
 0x305   : > { %1074 = dma.done.wait (!%p883_p2), %s811_s22, 512  }
 0x306   : > { %1076 = vsyncadd (!%p883_p2), %s811_s22, 4294966784  ;;  %p15_p3 = scmp.ge.s32.totalorder %s1158_s24, 6   ;;  %s1472_s18 = smov %s1083_s19 }
 0x307   : > { %s1473_s19 = smov %s1087_s20  ;;  %s1474_s20 = smov %s1169_s27 }
 0x308   : > { %s1475_s21 = smov %s1158_s24  ;;  %17 = sbr.rel (!%p15_p3) target bundleno = 3 (0x3), region = 76 }
 0x30f   :  { %816 = vsyncpa [#allocation3], 1 }
 0x310   :  { %818 = vsyncpa [#allocation3 + $0x1], 1 }

</bundles_post_ra>
